<compile_context>
chip_gen: v6e
topology: v6e:2x2x1
jax: 0.10.0
libtpu: 0.0.40
codegen_flags: <defaults>
</compile_context>

<pallas_src>
import functools

import jax
import jax.numpy as jnp
from jax.experimental import pallas as pl
from jax.experimental.pallas import tpu as pltpu

NEG_SLOPE = 0.15
BN_EPS = 1e-5


def _leaky(x):
    return jnp.where(x >= 0, x, NEG_SLOPE * x)


# --------------------------- stage 1: convs + MCN fusion + partial BN stats ---
def _mcn_stage1_kernel(c_up, tile_m, m_real, need_mask,
                       a0_ref, w0_ref, b0_ref,        # tildeAk conv (s_in folded)
                       akk_ref, wA_ref, bA_ref,       # Ak conv
                       ak_ref, wLW_ref, bLW_ref,      # fused [Lk | Wk] conv
                       soutv_ref,                     # (1, c_low) adaptiveScalar_out
                       out_ref, stats_ref):
    # Conv = im2col matmul (MXU) + (1, C) bias broadcast.
    tA = jnp.dot(a0_ref[...], w0_ref[...],
                 preferred_element_type=jnp.float32) + b0_ref[...]
    A = jnp.dot(akk_ref[...], wA_ref[...],
                preferred_element_type=jnp.float32) + bA_ref[...]
    LW = jnp.dot(ak_ref[...], wLW_ref[...],
                 preferred_element_type=jnp.float32) + bLW_ref[...]

    Lk = LW[:, :c_up]
    Wk = LW[:, c_up:]

    # tA already includes adaptiveScalar_in (folded into weights/bias).
    low = jnp.exp(tA) * soutv_ref[...] + jnp.maximum(_leaky(A), Wk)

    # Pre-BN output, written as two lane slices (no lane-dim concat).
    out_ref[:, :c_up] = Lk
    out_ref[:, c_up:] = low

    # Per-tile partial BN statistics (sum, sum of squares) with a row mask for
    # the padded tail tile (mask only generated when actually needed).
    if need_mask:
        rows = (pl.program_id(0) * tile_m
                + jax.lax.broadcasted_iota(jnp.int32, (tile_m, 1), 0))
        maskf = (rows < m_real).astype(jnp.float32)
        Lk_s = Lk * maskf
        low_s = low * maskf
    else:
        Lk_s = Lk
        low_s = low

    stats_ref[0, 0:1, :c_up] = jnp.sum(Lk_s, axis=0, keepdims=True)
    stats_ref[0, 1:2, :c_up] = jnp.sum(Lk_s * Lk, axis=0, keepdims=True)
    stats_ref[0, 0:1, c_up:] = jnp.sum(low_s, axis=0, keepdims=True)
    stats_ref[0, 1:2, c_up:] = jnp.sum(low_s * low, axis=0, keepdims=True)


# --------------------------- stage 2: BatchNorm normalize + LeakyReLU --------
def _bn_act_kernel(x_ref, st_ref, out_ref):
    y = (x_ref[...] - st_ref[0:1, :]) * st_ref[1:2, :]
    out_ref[...] = jnp.where(y >= 0, y, NEG_SLOPE * y)


# --------------------------- wrapper ------------------------------------------
def _im2col_3x3(x_nhwc, stride):
    """3x3 conv, padding=1, given stride -> (N*Ho*Wo, 9*C) patch matrix."""
    n, h, w, c = x_nhwc.shape
    xp = jnp.pad(x_nhwc, ((0, 0), (1, 1), (1, 1), (0, 0)))
    ho = (h + 2 - 3) // stride + 1
    wo = (w + 2 - 3) // stride + 1
    cols = []
    for dh in range(3):
        for dw in range(3):
            sl = xp[:, dh:dh + stride * (ho - 1) + 1:stride,
                    dw:dw + stride * (wo - 1) + 1:stride, :]
            cols.append(sl)
    patches = jnp.concatenate(cols, axis=-1)           # (N, Ho, Wo, 9*C)
    return patches.reshape(n * ho * wo, 9 * c), (ho, wo)


def _w_oihw_to_mat(w):
    """(Cout, Cin, 3, 3) -> (9*Cin, Cout), matching im2col (dh, dw, cin) order."""
    return jnp.transpose(w, (2, 3, 1, 0)).reshape(-1, w.shape[0])


@functools.partial(jax.jit, static_argnames=("strides", "tile_m"))
def mcn_block_forward(x_0, x_kk, x_k, params, strides=(2, 2, 2), tile_m=512):
    """x_* are NCHW float32 arrays (PyTorch convention)."""
    n = x_0.shape[0]

    # NCHW -> NHWC, then im2col (wrapper glue).
    a0, (ho, wo) = _im2col_3x3(jnp.transpose(x_0, (0, 2, 3, 1)), strides[0])
    akk, hw_kk = _im2col_3x3(jnp.transpose(x_kk, (0, 2, 3, 1)), strides[1])
    ak, hw_k = _im2col_3x3(jnp.transpose(x_k, (0, 2, 3, 1)), strides[2])
    assert (ho, wo) == hw_kk == hw_k, "output spatial sizes must match for concat"

    m = n * ho * wo
    c_up = params["w_Lk"].shape[0]
    c_low = params["w_Wk"].shape[0]
    c_tot = c_up + c_low

    # Tile M into blocks of tile_m rows (multiple of 8 sublanes), pad the tail.
    tile_m = max(8, (int(tile_m) + 7) // 8 * 8)
    num_tiles = -(-m // tile_m)
    m_pad = num_tiles * tile_m
    need_mask = (m_pad != m)
    if need_mask:
        pad = ((0, m_pad - m), (0, 0))
        a0 = jnp.pad(a0, pad)
        akk = jnp.pad(akk, pad)
        ak = jnp.pad(ak, pad)

    s_in = params["adaptiveScalar_in"].astype(jnp.float32)
    s_out = params["adaptiveScalar_out"].astype(jnp.float32)

    # Fold adaptiveScalar_in into the tildeAk conv; fuse the shared-LHS Lk/Wk
    # convs into one matmul against [w_Lk | w_Wk].
    w_tA = _w_oihw_to_mat(params["w_tildeAk"]) * s_in
    b_tA = (params["b_tildeAk"] * s_in)[None, :]
    w_Ak = _w_oihw_to_mat(params["w_Ak"])
    b_Ak = params["b_Ak"][None, :]
    w_LW = jnp.concatenate([_w_oihw_to_mat(params["w_Lk"]),
                            _w_oihw_to_mat(params["w_Wk"])], axis=1)
    b_LW = jnp.concatenate([params["b_Lk"], params["b_Wk"]])[None, :]
    s_out_vec = jnp.broadcast_to(s_out, (1, c_low)).astype(jnp.float32)

    k0, kkk, kk = a0.shape[1], akk.shape[1], ak.shape[1]

    def row_spec(cols):
        return pl.BlockSpec((tile_m, cols), lambda i: (i, 0))

    def full_spec(r, c):
        return pl.BlockSpec((r, c), lambda i: (0, 0))

    cparams = pltpu.CompilerParams(
        dimension_semantics=("parallel",),
        vmem_limit_bytes=32 * 1024 * 1024)

    kernel1 = functools.partial(_mcn_stage1_kernel, c_up, tile_m, m, need_mask)

    pre_bn, partial_stats = pl.pallas_call(
        kernel1,
        grid=(num_tiles,),
        out_shape=(jax.ShapeDtypeStruct((m_pad, c_tot), jnp.float32),
                   jax.ShapeDtypeStruct((num_tiles, 2, c_tot), jnp.float32)),
        in_specs=[row_spec(k0), full_spec(k0, c_low), full_spec(1, c_low),
                  row_spec(kkk), full_spec(kkk, c_low), full_spec(1, c_low),
                  row_spec(kk), full_spec(kk, c_tot), full_spec(1, c_tot),
                  full_spec(1, c_low)],
        out_specs=(row_spec(c_tot),
                   pl.BlockSpec((1, 2, c_tot), lambda i: (i, 0, 0))),
        compiler_params=cparams,
    )(a0, w_tA, b_tA, akk, w_Ak, b_Ak, ak, w_LW, b_LW, s_out_vec)

    # Tiny cross-tile reduction (glue): biased batch stats over the real rows.
    sums = jnp.sum(partial_stats[:, 0, :], axis=0)
    sqs = jnp.sum(partial_stats[:, 1, :], axis=0)
    mean = sums / m
    var = jnp.maximum(sqs / m - mean * mean, 0.0)
    inv = jax.lax.rsqrt(var + BN_EPS)
    st = jnp.stack([mean, inv], axis=0)                 # (2, c_tot)

    out = pl.pallas_call(
        _bn_act_kernel,
        grid=(num_tiles,),
        out_shape=jax.ShapeDtypeStruct((m_pad, c_tot), jnp.float32),
        in_specs=[row_spec(c_tot), full_spec(2, c_tot)],
        out_specs=row_spec(c_tot),
        compiler_params=cparams,
    )(pre_bn, st)

    # (M, C) rows ordered (n, ho, wo) -> NCHW.
    out = out[:m].reshape(n, ho, wo, c_tot)
    return jnp.transpose(out, (0, 3, 1, 2))


# ----------------------------- reference (pure JAX) ---------------------------
def _conv_ref(x_nchw, w, b, stride):
    out = jax.lax.conv_general_dilated(
        x_nchw, w, (stride, stride), ((1, 1), (1, 1)),
        dimension_numbers=("NCHW", "OIHW", "NCHW"))
    return out + b[None, :, None, None]


def mcn_block_reference(x_0, x_kk, x_k, params, strides=(2, 2, 2)):
    LkX = _conv_ref(x_k, params["w_Lk"], params["b_Lk"], strides[2])
    WkX = _conv_ref(x_k, params["w_Wk"], params["b_Wk"], strides[2])
    AkX = _conv_ref(x_kk, params["w_Ak"], params["b_Ak"], strides[1])
    sigmaAkX = _leaky(AkX)
    tildeAkX = _conv_ref(x_0, params["w_tildeAk"], params["b_tildeAk"], strides[0])
    low = (jnp.exp(tildeAkX * params["adaptiveScalar_in"]) * params["adaptiveScalar_out"]
           + jnp.maximum(sigmaAkX, WkX))
    out = jnp.concatenate([LkX, low], axis=1)
    mean = jnp.mean(out, axis=(0, 2, 3), keepdims=True)
    var = jnp.mean((out - mean) ** 2, axis=(0, 2, 3), keepdims=True)
    bn = (out - mean) * jax.lax.rsqrt(var + BN_EPS)
    return _leaky(bn)


if __name__ == "__main__":
    # Small shapes: batch=2, spatial=16x16, x0_dim=4, xkk_dim=6, xk_dim=8,
    # out_dim=[8, 8], strides=[2, 2, 2] -> output (2, 16, 8, 8).
    N, H, W = 2, 16, 16
    x0_dim, xkk_dim, xk_dim = 4, 6, 8
    up_dim, low_dim = 8, 8

    key = jax.random.PRNGKey(0)
    ks = jax.random.split(key, 16)
    norm = lambda k, s: 0.1 * jax.random.normal(k, s, dtype=jnp.float32)

    params = {
        "w_Ak": norm(ks[0], (low_dim, xkk_dim, 3, 3)),
        "b_Ak": norm(ks[1], (low_dim,)),
        "w_tildeAk": norm(ks[2], (low_dim, x0_dim, 3, 3)),
        "b_tildeAk": norm(ks[3], (low_dim,)),
        "w_Wk": norm(ks[4], (low_dim, xk_dim, 3, 3)),
        "b_Wk": norm(ks[5], (low_dim,)),
        "w_Lk": norm(ks[6], (up_dim, xk_dim, 3, 3)),
        "b_Lk": norm(ks[7], (up_dim,)),
        "adaptiveScalar_in": jnp.float32(0.01),
        "adaptiveScalar_out": jnp.float32(0.01),
    }

    x_0 = jax.random.normal(ks[8], (N, x0_dim, H, W), dtype=jnp.float32)
    x_kk = jax.random.normal(ks[9], (N, xkk_dim, H, W), dtype=jnp.float32)
    x_k = jax.random.normal(ks[10], (N, xk_dim, H, W), dtype=jnp.float32)

    ref = mcn_block_reference(x_0, x_kk, x_k, params)

    # Check 1: tile_m=64 -> 2-step grid, no ragged tail (M = 128).
    out = jax.block_until_ready(mcn_block_forward(x_0, x_kk, x_k, params, tile_m=64))
    assert out.shape == (N, up_dim + low_dim, H // 2, W // 2), out.shape
    assert jnp.allclose(out, ref, atol=1e-3, rtol=1e-3), \
        float(jnp.max(jnp.abs(out - ref)))

    # Check 2: tile_m=48 -> 3-step grid with a masked ragged tail (M padded to 144).
    out2 = jax.block_until_ready(mcn_block_forward(x_0, x_kk, x_k, params, tile_m=48))
    assert jnp.allclose(out2, ref, atol=1e-3, rtol=1e-3), \
        float(jnp.max(jnp.abs(out2 - ref)))

    print("KERNEL_OK")
</pallas_src>

<mosaic_0001>
module attributes {stable_mosaic.version = 11 : i64} {
  func.func @_mcn_stage1_kernel(%arg0: i32, %arg1: memref<64x36xf32, #tpu.memory_space<vmem>>, %arg2: memref<36x8xf32, #tpu.memory_space<vmem>>, %arg3: memref<1x8xf32, #tpu.memory_space<vmem>>, %arg4: memref<64x54xf32, #tpu.memory_space<vmem>>, %arg5: memref<54x8xf32, #tpu.memory_space<vmem>>, %arg6: memref<1x8xf32, #tpu.memory_space<vmem>>, %arg7: memref<64x72xf32, #tpu.memory_space<vmem>>, %arg8: memref<72x16xf32, #tpu.memory_space<vmem>>, %arg9: memref<1x16xf32, #tpu.memory_space<vmem>>, %arg10: memref<1x8xf32, #tpu.memory_space<vmem>>, %arg11: memref<64x16xf32, #tpu.memory_space<vmem>>, %arg12: memref<1x2x16xf32, #tpu.memory_space<vmem>>) attributes {dimension_semantics = [#tpu.dimension_semantics<parallel>], iteration_bounds = array<i64: 2>, scalar_prefetch = 0 : i64, scratch_operands = 0 : i64, tpu.core_type = #tpu.core_type<tc>, window_params = [{transform_indices = @transform_0, window_bounds = array<i64: 64, 36>}, {pipeline_mode = #tpu.pipeline_mode<synchronous>, transform_indices = @transform_1, window_bounds = array<i64: 36, 8>}, {pipeline_mode = #tpu.pipeline_mode<synchronous>, transform_indices = @transform_2, window_bounds = array<i64: 1, 8>}, {transform_indices = @transform_3, window_bounds = array<i64: 64, 54>}, {pipeline_mode = #tpu.pipeline_mode<synchronous>, transform_indices = @transform_4, window_bounds = array<i64: 54, 8>}, {pipeline_mode = #tpu.pipeline_mode<synchronous>, transform_indices = @transform_5, window_bounds = array<i64: 1, 8>}, {transform_indices = @transform_6, window_bounds = array<i64: 64, 72>}, {pipeline_mode = #tpu.pipeline_mode<synchronous>, transform_indices = @transform_7, window_bounds = array<i64: 72, 16>}, {pipeline_mode = #tpu.pipeline_mode<synchronous>, transform_indices = @transform_8, window_bounds = array<i64: 1, 16>}, {pipeline_mode = #tpu.pipeline_mode<synchronous>, transform_indices = @transform_9, window_bounds = array<i64: 1, 8>}, {transform_indices = @transform_10, window_bounds = array<i64: 64, 16>}, {transform_indices = @transform_11, window_bounds = array<i64: 1, 2, 16>}]} {
    %c0 = arith.constant 0 : index
    %c0_0 = arith.constant 0 : index
    %0 = vector.load %arg1[%c0, %c0_0] : memref<64x36xf32, #tpu.memory_space<vmem>>, vector<64x36xf32>
    %c0_1 = arith.constant 0 : index
    %c0_2 = arith.constant 0 : index
    %1 = vector.load %arg2[%c0_1, %c0_2] : memref<36x8xf32, #tpu.memory_space<vmem>>, vector<36x8xf32>
    %cst = arith.constant dense<0.000000e+00> : vector<64x8xf32>
    %2 = tpu.matmul %0, %1, %cst {dimension_numbers = #tpu.dot_dimension_numbers<[1], [0], [0], [1], [0, 0, 1, 1], [], []>} : vector<64x36xf32>, vector<36x8xf32>, vector<64x8xf32> -> vector<64x8xf32>
    %c0_3 = arith.constant 0 : index
    %c0_4 = arith.constant 0 : index
    %3 = vector.load %arg3[%c0_3, %c0_4] : memref<1x8xf32, #tpu.memory_space<vmem>>, vector<1x8xf32>
    %4 = vector.broadcast %3 : vector<1x8xf32> to vector<64x8xf32>
    %5 = arith.addf %2, %4 : vector<64x8xf32>
    %c0_5 = arith.constant 0 : index
    %c0_6 = arith.constant 0 : index
    %6 = vector.load %arg4[%c0_5, %c0_6] : memref<64x54xf32, #tpu.memory_space<vmem>>, vector<64x54xf32>
    %c0_7 = arith.constant 0 : index
    %c0_8 = arith.constant 0 : index
    %7 = vector.load %arg5[%c0_7, %c0_8] : memref<54x8xf32, #tpu.memory_space<vmem>>, vector<54x8xf32>
    %cst_9 = arith.constant dense<0.000000e+00> : vector<64x8xf32>
    %8 = tpu.matmul %6, %7, %cst_9 {dimension_numbers = #tpu.dot_dimension_numbers<[1], [0], [0], [1], [0, 0, 1, 1], [], []>} : vector<64x54xf32>, vector<54x8xf32>, vector<64x8xf32> -> vector<64x8xf32>
    %c0_10 = arith.constant 0 : index
    %c0_11 = arith.constant 0 : index
    %9 = vector.load %arg6[%c0_10, %c0_11] : memref<1x8xf32, #tpu.memory_space<vmem>>, vector<1x8xf32>
    %10 = vector.broadcast %9 : vector<1x8xf32> to vector<64x8xf32>
    %11 = arith.addf %8, %10 : vector<64x8xf32>
    %c0_12 = arith.constant 0 : index
    %c0_13 = arith.constant 0 : index
    %12 = vector.load %arg7[%c0_12, %c0_13] : memref<64x72xf32, #tpu.memory_space<vmem>>, vector<64x72xf32>
    %c0_14 = arith.constant 0 : index
    %c0_15 = arith.constant 0 : index
    %13 = vector.load %arg8[%c0_14, %c0_15] : memref<72x16xf32, #tpu.memory_space<vmem>>, vector<72x16xf32>
    %cst_16 = arith.constant dense<0.000000e+00> : vector<64x16xf32>
    %14 = tpu.matmul %12, %13, %cst_16 {dimension_numbers = #tpu.dot_dimension_numbers<[1], [0], [0], [1], [0, 0, 1, 1], [], []>} : vector<64x72xf32>, vector<72x16xf32>, vector<64x16xf32> -> vector<64x16xf32>
    %c0_17 = arith.constant 0 : index
    %c0_18 = arith.constant 0 : index
    %15 = vector.load %arg9[%c0_17, %c0_18] : memref<1x16xf32, #tpu.memory_space<vmem>>, vector<1x16xf32>
    %16 = vector.broadcast %15 : vector<1x16xf32> to vector<64x16xf32>
    %17 = arith.addf %14, %16 : vector<64x16xf32>
    %18 = vector.extract_strided_slice %17 {offsets = [0, 0], sizes = [64, 8], strides = [1, 1]} : vector<64x16xf32> to vector<64x8xf32>
    %19 = vector.extract_strided_slice %17 {offsets = [0, 8], sizes = [64, 8], strides = [1, 1]} : vector<64x16xf32> to vector<64x8xf32>
    %20 = math.exp %5 : vector<64x8xf32>
    %c0_19 = arith.constant 0 : index
    %c0_20 = arith.constant 0 : index
    %21 = vector.load %arg10[%c0_19, %c0_20] : memref<1x8xf32, #tpu.memory_space<vmem>>, vector<1x8xf32>
    %22 = vector.broadcast %21 : vector<1x8xf32> to vector<64x8xf32>
    %23 = arith.mulf %20, %22 : vector<64x8xf32>
    %cst_21 = arith.constant 0.000000e+00 : f32
    %24 = vector.broadcast %cst_21 : f32 to vector<64x8xf32>
    %25 = arith.cmpf oge, %11, %24 : vector<64x8xf32>
    %cst_22 = arith.constant 1.500000e-01 : f32
    %26 = vector.broadcast %cst_22 : f32 to vector<64x8xf32>
    %27 = arith.mulf %26, %11 : vector<64x8xf32>
    %28 = arith.select %25, %11, %27 : vector<64x8xi1>, vector<64x8xf32>
    %29 = arith.maximumf %28, %19 : vector<64x8xf32>
    %30 = arith.addf %23, %29 : vector<64x8xf32>
    %c0_23 = arith.constant 0 : index
    %c0_24 = arith.constant 0 : index
    %31 = vector.load %arg11[%c0_23, %c0_24] : memref<64x16xf32, #tpu.memory_space<vmem>>, vector<64x8xf32>
    tpu.vector_store %arg11[%c0_23, %c0_24], %18 {strides = array<i32>} : memref<64x16xf32, #tpu.memory_space<vmem>>, vector<64x8xf32>,
    %c0_25 = arith.constant 0 : index
    %c8 = arith.constant 8 : index
    %32 = vector.load %arg11[%c0_25, %c8] : memref<64x16xf32, #tpu.memory_space<vmem>>, vector<64x8xf32>
    tpu.vector_store %arg11[%c0_25, %c8], %30 {strides = array<i32>} : memref<64x16xf32, #tpu.memory_space<vmem>>, vector<64x8xf32>,
    %cst_26 = arith.constant dense<0.000000e+00> : vector<8xf32>
    %33 = vector.multi_reduction <add>, %18, %cst_26 [0] : vector<64x8xf32> to vector<8xf32>
    %34 = vector.shape_cast %33 : vector<8xf32> to vector<1x8xf32>
    %c0_27 = arith.constant 0 : index
    %c0_28 = arith.constant 0 : index
    %c0_29 = arith.constant 0 : index
    %35 = vector.load %arg12[%c0_27, %c0_28, %c0_29] : memref<1x2x16xf32, #tpu.memory_space<vmem>>, vector<1x1x8xf32>
    %36 = vector.shape_cast %35 : vector<1x1x8xf32> to vector<1x8xf32>
    %37 = vector.shape_cast %34 : vector<1x8xf32> to vector<1x1x8xf32>
    tpu.vector_store %arg12[%c0_27, %c0_28, %c0_29], %37 {strides = array<i32>} : memref<1x2x16xf32, #tpu.memory_space<vmem>>, vector<1x1x8xf32>,
    %38 = arith.mulf %18, %18 : vector<64x8xf32>
    %cst_30 = arith.constant dense<0.000000e+00> : vector<8xf32>
    %39 = vector.multi_reduction <add>, %38, %cst_30 [0] : vector<64x8xf32> to vector<8xf32>
    %40 = vector.shape_cast %39 : vector<8xf32> to vector<1x8xf32>
    %c0_31 = arith.constant 0 : index
    %c1 = arith.constant 1 : index
    %c0_32 = arith.constant 0 : index
    %41 = vector.load %arg12[%c0_31, %c1, %c0_32] : memref<1x2x16xf32, #tpu.memory_space<vmem>>, vector<1x1x8xf32>
    %42 = vector.shape_cast %41 : vector<1x1x8xf32> to vector<1x8xf32>
    %43 = vector.shape_cast %40 : vector<1x8xf32> to vector<1x1x8xf32>
    tpu.vector_store %arg12[%c0_31, %c1, %c0_32], %43 {strides = array<i32>} : memref<1x2x16xf32, #tpu.memory_space<vmem>>, vector<1x1x8xf32>,
    %cst_33 = arith.constant dense<0.000000e+00> : vector<8xf32>
    %44 = vector.multi_reduction <add>, %30, %cst_33 [0] : vector<64x8xf32> to vector<8xf32>
    %45 = vector.shape_cast %44 : vector<8xf32> to vector<1x8xf32>
    %c0_34 = arith.constant 0 : index
    %c0_35 = arith.constant 0 : index
    %c8_36 = arith.constant 8 : index
    %46 = vector.load %arg12[%c0_34, %c0_35, %c8_36] : memref<1x2x16xf32, #tpu.memory_space<vmem>>, vector<1x1x8xf32>
    %47 = vector.shape_cast %46 : vector<1x1x8xf32> to vector<1x8xf32>
    %48 = vector.shape_cast %45 : vector<1x8xf32> to vector<1x1x8xf32>
    tpu.vector_store %arg12[%c0_34, %c0_35, %c8_36], %48 {strides = array<i32>} : memref<1x2x16xf32, #tpu.memory_space<vmem>>, vector<1x1x8xf32>,
    %49 = arith.mulf %30, %30 : vector<64x8xf32>
    %cst_37 = arith.constant dense<0.000000e+00> : vector<8xf32>
    %50 = vector.multi_reduction <add>, %49, %cst_37 [0] : vector<64x8xf32> to vector<8xf32>
    %51 = vector.shape_cast %50 : vector<8xf32> to vector<1x8xf32>
    %c0_38 = arith.constant 0 : index
    %c1_39 = arith.constant 1 : index
    %c8_40 = arith.constant 8 : index
    %52 = vector.load %arg12[%c0_38, %c1_39, %c8_40] : memref<1x2x16xf32, #tpu.memory_space<vmem>>, vector<1x1x8xf32>
    %53 = vector.shape_cast %52 : vector<1x1x8xf32> to vector<1x8xf32>
    %54 = vector.shape_cast %51 : vector<1x8xf32> to vector<1x1x8xf32>
    tpu.vector_store %arg12[%c0_38, %c1_39, %c8_40], %54 {strides = array<i32>} : memref<1x2x16xf32, #tpu.memory_space<vmem>>, vector<1x1x8xf32>,
    return
  }
  func.func @transform_0(%arg0: i32) -> (i32, i32) {
    %c0_i32 = arith.constant 0 : i32
    %c0_i32_0 = arith.constant 0 : i32
    return %arg0, %c0_i32 : i32, i32
  }
  func.func @transform_1(%arg0: i32) -> (i32, i32) {
    %c0_i32 = arith.constant 0 : i32
    %c0_i32_0 = arith.constant 0 : i32
    %c0_i32_1 = arith.constant 0 : i32
    return %c0_i32, %c0_i32_0 : i32, i32
  }
  func.func @transform_2(%arg0: i32) -> (i32, i32) {
    %c0_i32 = arith.constant 0 : i32
    %c0_i32_0 = arith.constant 0 : i32
    %c0_i32_1 = arith.constant 0 : i32
    return %c0_i32, %c0_i32_0 : i32, i32
  }
  func.func @transform_3(%arg0: i32) -> (i32, i32) {
    %c0_i32 = arith.constant 0 : i32
    %c0_i32_0 = arith.constant 0 : i32
    return %arg0, %c0_i32 : i32, i32
  }
  func.func @transform_4(%arg0: i32) -> (i32, i32) {
    %c0_i32 = arith.constant 0 : i32
    %c0_i32_0 = arith.constant 0 : i32
    %c0_i32_1 = arith.constant 0 : i32
    return %c0_i32, %c0_i32_0 : i32, i32
  }
  func.func @transform_5(%arg0: i32) -> (i32, i32) {
    %c0_i32 = arith.constant 0 : i32
    %c0_i32_0 = arith.constant 0 : i32
    %c0_i32_1 = arith.constant 0 : i32
    return %c0_i32, %c0_i32_0 : i32, i32
  }
  func.func @transform_6(%arg0: i32) -> (i32, i32) {
    %c0_i32 = arith.constant 0 : i32
    %c0_i32_0 = arith.constant 0 : i32
    return %arg0, %c0_i32 : i32, i32
  }
  func.func @transform_7(%arg0: i32) -> (i32, i32) {
    %c0_i32 = arith.constant 0 : i32
    %c0_i32_0 = arith.constant 0 : i32
    %c0_i32_1 = arith.constant 0 : i32
    return %c0_i32, %c0_i32_0 : i32, i32
  }
  func.func @transform_8(%arg0: i32) -> (i32, i32) {
    %c0_i32 = arith.constant 0 : i32
    %c0_i32_0 = arith.constant 0 : i32
    %c0_i32_1 = arith.constant 0 : i32
    return %c0_i32, %c0_i32_0 : i32, i32
  }
  func.func @transform_9(%arg0: i32) -> (i32, i32) {
    %c0_i32 = arith.constant 0 : i32
    %c0_i32_0 = arith.constant 0 : i32
    %c0_i32_1 = arith.constant 0 : i32
    return %c0_i32, %c0_i32_0 : i32, i32
  }
  func.func @transform_10(%arg0: i32) -> (i32, i32) {
    %c0_i32 = arith.constant 0 : i32
    %c0_i32_0 = arith.constant 0 : i32
    return %arg0, %c0_i32 : i32, i32
  }
  func.func @transform_11(%arg0: i32) -> (i32, i32, i32) {
    %c0_i32 = arith.constant 0 : i32
    %c0_i32_0 = arith.constant 0 : i32
    %c0_i32_1 = arith.constant 0 : i32
    return %arg0, %c0_i32, %c0_i32_0 : i32, i32, i32
  }
}

module attributes {stable_mosaic.version = 11 : i64} {
  func.func @_bn_act_kernel(%arg0: i32, %arg1: memref<64x16xf32, #tpu.memory_space<vmem>>, %arg2: memref<2x16xf32, #tpu.memory_space<vmem>>, %arg3: memref<64x16xf32, #tpu.memory_space<vmem>>) attributes {dimension_semantics = [#tpu.dimension_semantics<parallel>], iteration_bounds = array<i64: 2>, scalar_prefetch = 0 : i64, scratch_operands = 0 : i64, tpu.core_type = #tpu.core_type<tc>, window_params = [{transform_indices = @transform_0, window_bounds = array<i64: 64, 16>}, {pipeline_mode = #tpu.pipeline_mode<synchronous>, transform_indices = @transform_1, window_bounds = array<i64: 2, 16>}, {transform_indices = @transform_2, window_bounds = array<i64: 64, 16>}]} {
    %c0 = arith.constant 0 : index
    %c0_0 = arith.constant 0 : index
    %0 = vector.load %arg1[%c0, %c0_0] : memref<64x16xf32, #tpu.memory_space<vmem>>, vector<64x16xf32>
    %c0_1 = arith.constant 0 : index
    %c0_2 = arith.constant 0 : index
    %1 = vector.load %arg2[%c0_1, %c0_2] : memref<2x16xf32, #tpu.memory_space<vmem>>, vector<1x16xf32>
    %2 = vector.broadcast %1 : vector<1x16xf32> to vector<64x16xf32>
    %3 = arith.subf %0, %2 : vector<64x16xf32>
    %c1 = arith.constant 1 : index
    %c0_3 = arith.constant 0 : index
    %4 = vector.load %arg2[%c1, %c0_3] : memref<2x16xf32, #tpu.memory_space<vmem>>, vector<1x16xf32>
    %5 = vector.broadcast %4 : vector<1x16xf32> to vector<64x16xf32>
    %6 = arith.mulf %3, %5 : vector<64x16xf32>
    %cst = arith.constant 0.000000e+00 : f32
    %7 = vector.broadcast %cst : f32 to vector<64x16xf32>
    %8 = arith.cmpf oge, %6, %7 : vector<64x16xf32>
    %cst_4 = arith.constant 1.500000e-01 : f32
    %9 = vector.broadcast %cst_4 : f32 to vector<64x16xf32>
    %10 = arith.mulf %9, %6 : vector<64x16xf32>
    %11 = arith.select %8, %6, %10 : vector<64x16xi1>, vector<64x16xf32>
    %c0_5 = arith.constant 0 : index
    %c0_6 = arith.constant 0 : index
    %12 = vector.load %arg3[%c0_5, %c0_6] : memref<64x16xf32, #tpu.memory_space<vmem>>, vector<64x16xf32>
    tpu.vector_store %arg3[%c0_5, %c0_6], %11 {strides = array<i32>} : memref<64x16xf32, #tpu.memory_space<vmem>>, vector<64x16xf32>,
    return
  }
  func.func @transform_0(%arg0: i32) -> (i32, i32) {
    %c0_i32 = arith.constant 0 : i32
    %c0_i32_0 = arith.constant 0 : i32
    return %arg0, %c0_i32 : i32, i32
  }
  func.func @transform_1(%arg0: i32) -> (i32, i32) {
    %c0_i32 = arith.constant 0 : i32
    %c0_i32_0 = arith.constant 0 : i32
    %c0_i32_1 = arith.constant 0 : i32
    return %c0_i32, %c0_i32_0 : i32, i32
  }
  func.func @transform_2(%arg0: i32) -> (i32, i32) {
    %c0_i32 = arith.constant 0 : i32
    %c0_i32_0 = arith.constant 0 : i32
    return %arg0, %c0_i32 : i32, i32
  }
}

</mosaic_0001>

<bundles_post_ra>
// kernel: mcn_block_forward.3
= control target key start
LH: loop header
LB: loop body
LE: loop exit
PB: predicated region body
PF: predicated region fallthrough
CT: control target
= control target key end

     0   :  { %7 = vsyncpa [#allocation3], 0  ;;  %s546_s0 = inlined_call_operand.vmem [shape: f32[128,16], index: 0, kind: input, shape index: {}]   ;;  %s547_s1 = inlined_call_operand.vmem [shape: f32[2,16], index: 1, kind: input, shape index: {}]   ;;  %s548_s2 = inlined_call_operand.hbm [shape: f32[128,16], index: 2, kind: output, shape index: {}]  }
   0x1   :  { %9 = vsyncpa [#allocation3 + $0x1], 0  ;;  %s424_s9 = smov 0   ;;  %s426_s10 = smov 0  }
   0x2   :  { %s428_s11 = smov 0   ;;  %s430_s12 = smov 0  }
   0x3 LB: > { %s445_s13 = sadd.s32 4294967295, %s404_s12   ;;  %s288_s14 = sadd.s32 4294967294, %s404_s12   ;;  %s404_s12 = sphi %s430_s12, %s554_s12   ;;  %s400_s11 = sphi %s428_s11, %s553_s11   ;;  %s396_s10 = sphi %s426_s10, %s552_s10   ;;  %s392_s9 = sphi %s424_s9, %s551_s9  }
   0x4   : > { %s449_s15 = sadd.s32 1, %s404_s12   ;;  %s69_s16 = sadd.s32 1, %s400_s11 }
   0x5   : > { %s66_s17 = ssub.s32 %s404_s12, %s449_s15  ;;  %p79_p0 = scmp.ne.s32.totalorder %s400_s11, %s396_s10 }
   0x6   : > { %p67_p1 = scmp.eq.s32.totalorder %s66_s17, 0  ;;  %p80_p2 = scmp.eq.s32.totalorder %s445_s13, 1 }
   0x7   : > { %p85_p3 = scmp.ne.s32.totalorder %s396_s10, %s392_s9  ;;  %p86_p4 = scmp.eq.s32.totalorder %s288_s14, 1 }
   0x8   : > { %s460_s18 = scalar_select %p67_p1, %s400_s11, %s69_s16  }
   0x9   : > { %p462_p5 = por %p80_p2, %p79_p0  ;;  %p466_p6 = por %p86_p4, %p85_p3 }
   0xa   : > { %p291_p7 = scmp.ge.s32.totalorder %s404_s12, 1  ;;  %p116_p8 = scmp.lt.s32.totalorder %s404_s12, 3 }
   0xc   : > { %p117_p9 = pnand %p291_p7, %p116_p8 }
   0xd   : > { %s293_s21 = sshll.u32 (!%p117_p9), %s445_s13, 3  ;;  %s135_s22 = sand.u32 (!%p117_p9), 1, %s396_s10  }
   0xe   : > { %120 = sbr.rel (%p117_p9) target bundleno = 51 (0x33), region = 28  ;;  %p139_p10 = scmp.lt.s32.totalorder (!%p117_p9), %s293_s21, 15 }
   0xf   : > { %s485_s3 = sshll.u32 (!%p117_p9), %s135_s22, 6  ;;  %s302_s6 = sshll.u32 (!%p117_p9), %s445_s13, 10 }
  0x10   : > { %s137_s4 = scalar_lea.vmem (!%p117_p9), [#allocation2], %s485_s3  ;;  %s500_s13 = scalar_lea.hbm (!%p117_p9), %s548_s2, %s302_s6 }
  0x11   : > { %s226_s5 = sshll.u32 (!%p117_p9), %s137_s4, 4  ;;  %s506_s14 = scalar_lea.sflag (!%p117_p9), [#allocation3], %s135_s22  ;;  %s494_s5 = int_to_ptr.vmem [resolvable:$true] %s226_s5 }
  0x12   : > { %s344_s16 = scalar_lea.vmem (!%p117_p9), %s494_s5, 1024  ;;  %s406_s17 = smov (!%p117_p9), [#allocation2]  }
  0x13   : > { %s556_s21 = smov (!%p139_p10, %s293_s21), 15  ;;  %v295_v0 = vld [vmem:[%s547_s1] ss:$0 sm:$0xff]  ;;  %v296_v1 = vld [vmem:[%s547_s1 + $0x1] ss:$0 sm:$0xff]  ;;  %vm203_vm0 = vcmask 130048   ;;  %p345_p11 = scmp.ne.s32.totalorder %s494_s5, %s344_s16 }
  0x14   : > { %s294_s23 = sshll.u32 %s556_s21, 3  ;;  %s348_s21 = sshll.u32 %s406_s17, 4  ;;  %s349_s21 = int_to_ptr.vmem [resolvable:$false] %s348_s21 }
  0x15   : > { %s142_s28 = scalar_lea.vmem %s546_s0, %s294_s23  ;;  %p346_p12 = pnand %p345_p11, %p462_p5 }
  0x16   : > { %v145_v2 = vld [vmem:[%s142_s28] sm:$0xff]  ;;  %v146_v3 = vld [vmem:[%s142_s28 + $0x8] sm:$0xff]  ;;  %v147_v4 = vld [vmem:[%s142_s28 + $0x10] sm:$0xff]  ;;  %s350_s23 = scalar_lea.vmem %s349_s21, 2048  ;;  %p351_p0 = scmp.lt.s32.totalorder %s494_s5, %s349_s21 }
  0x17   : > { %v158_v5 = vsub.f32 %v145_v2, %v295_v0  ;;  %v159_v6 = vsub.f32 %v146_v3, %v295_v0  ;;  %v160_v7 = vsub.f32 %v147_v4, %v295_v0  ;;  %v148_v8 = vld [vmem:[%s142_s28 + $0x18] sm:$0xff]  ;;  %v149_v9 = vld [vmem:[%s142_s28 + $0x20] sm:$0xff]  ;;  %v150_v10 = vld [vmem:[%s142_s28 + $0x28] sm:$0xff]  ;;  %p347_p13 = pneg %p346_p12  ;;  %p352_p1 = scmp.lt.s32.totalorder %s350_s23, %s344_s16 }
  0x18   : > { %v161_v11 = vsub.f32 %v148_v8, %v295_v0  ;;  %v162_v12 = vsub.f32 %v149_v9, %v295_v0  ;;  %v163_v13 = vsub.f32 %v150_v10, %v295_v0  ;;  %v151_v14 = vld [vmem:[%s142_s28 + $0x30] sm:$0xff]  ;;  %v152_v15 = vld [vmem:[%s142_s28 + $0x38] sm:$0xff] }
  0x19   : > { %v171_v16 = vmul.f32 %v296_v1, %v158_v5  ;;  %v172_v17 = vmul.f32 %v296_v1, %v159_v6  ;;  %v173_v18 = vmul.f32 %v296_v1, %v160_v7  ;;  %v164_v19 = vsub.f32 %v151_v14, %v295_v0  ;;  %p353_p2 = por %p352_p1, %p351_p0 }
  0x1a   : > { %v174_v20 = vmul.f32 %v296_v1, %v161_v11  ;;  %v175_v21 = vmul.f32 %v296_v1, %v162_v12  ;;  %v176_v22 = vmul.f32 %v296_v1, %v163_v13  ;;  %v165_v23 = vsub.f32 %v152_v15, %v295_v0 }
  0x1b   : > { %vm179_vm1 = vcmp.ge.f32.partialorder %v171_v16, 0.0  ;;  %v187_v24 = vmul.f32 0.15, %v171_v16  ;;  %vm180_vm2 = vcmp.ge.f32.partialorder %v172_v17, 0.0  ;;  %v188_v25 = vmul.f32 0.15, %v172_v17  ;;  %p354_p3 = pnand %p353_p2, %p347_p13 }
  0x1c   : > { %vm181_vm3 = vcmp.ge.f32.partialorder %v173_v18, 0.0  ;;  %v189_v26 = vmul.f32 0.15, %v173_v18  ;;  %vm182_vm4 = vcmp.ge.f32.partialorder %v174_v20, 0.0  ;;  %v190_v27 = vmul.f32 0.15, %v174_v20 }
  0x1d   : > { %v195_v28 = vsel %vm179_vm1, %v171_v16, %v187_v24  ;;  %v196_v29 = vsel %vm180_vm2, %v172_v17, %v188_v25  ;;  %vm183_vm5 = vcmp.ge.f32.partialorder %v175_v21, 0.0  ;;  %v191_v30 = vmul.f32 0.15, %v175_v21 }
  0x1e   : > { %204 = vst.msk [vmem:[%s137_s4] sm:$0xff] %vm203_vm0, %v195_v28  ;;  %205 = vst.msk [vmem:[%s137_s4 + $0x8] sm:$0xff] %vm203_vm0, %v196_v29  ;;  %v197_v31 = vsel %vm181_vm3, %v173_v18, %v189_v26  ;;  %v198_v32 = vsel %vm182_vm4, %v174_v20, %v190_v27  ;;  %vm184_vm6 = vcmp.ge.f32.partialorder %v176_v22, 0.0  ;;  %v192_v33 = vmul.f32 0.15, %v176_v22 }
  0x1f   : > { %206 = vst.msk [vmem:[%s137_s4 + $0x10] sm:$0xff] %vm203_vm0, %v197_v31  ;;  %207 = vst.msk [vmem:[%s137_s4 + $0x18] sm:$0xff] %vm203_vm0, %v198_v32  ;;  %v199_v34 = vsel %vm183_vm5, %v175_v21, %v191_v30  ;;  %v177_v35 = vmul.f32 %v296_v1, %v164_v19  ;;  %v178_v36 = vmul.f32 %v296_v1, %v165_v23 }
  0x20   : > { %208 = vst.msk [vmem:[%s137_s4 + $0x20] sm:$0xff] %vm203_vm0, %v199_v34  ;;  %v200_v37 = vsel %vm184_vm6, %v176_v22, %v192_v33 }
  0x21   : > { %209 = vst.msk [vmem:[%s137_s4 + $0x28] sm:$0xff] %vm203_vm0, %v200_v37  ;;  %vm185_vm7 = vcmp.ge.f32.partialorder %v177_v35, 0.0  ;;  %v193_v38 = vmul.f32 0.15, %v177_v35  ;;  %vm186_vm8 = vcmp.ge.f32.partialorder %v178_v36, 0.0 }
  0x22   : > { %v194_v39 = vmul.f32 0.15, %v178_v36 }
  0x23   : > { %v201_v40 = vsel %vm185_vm7, %v177_v35, %v193_v38 }
  0x24   : > { %v202_v41 = vsel %vm186_vm8, %v178_v36, %v194_v39  ;;  %210 = vst.msk [vmem:[%s137_s4 + $0x30] sm:$0xff] %vm203_vm0, %v201_v40 }
  0x25   : > { %211 = vst.msk [vmem:[%s137_s4 + $0x38] sm:$0xff] %vm203_vm0, %v202_v41 }
  0x26   : > { %357 = shalt.err (!%p354_p3)
}
  0x27   : > { %s358_s22 = scalar_lea.hbm %s500_s13, 1024  ;;  %s362_s26 = scalar_lea.hbm %s548_s2, 2048 }
  0x28   : > { %p359_p4 = scmp.ne.s32.totalorder %s500_s13, %s358_s22  ;;  %p363_p9 = scmp.lt.s32.totalorder %s500_s13, %s548_s2 }
  0x29   : > { %p364_p10 = scmp.lt.s32.totalorder %s362_s26, %s358_s22 }
  0x2a   : > { %p360_p7 = pnand %p359_p4, %p462_p5 }
  0x2b   : > { %p365_p11 = por %p364_p10, %p363_p9 }
  0x2c   : > { %p361_p8 = pneg %p360_p7 }
  0x2e   : > { %p366_p12 = pnand %p365_p11, %p361_p8 }
  0x30   : > { %369 = shalt.err (!%p366_p12)
}
  0x31   : > { %s407_s29 = smov 128   ;;  %s408_s30 = smov 8  }
  0x32   : > { %303 = dma.vmem_to_hbm [thread:$0]  (%p462_p5), %s494_s5, 1024, %s500_s13, %s506_s14, %s407_s29, %s407_s29, %s408_s30  }
  0x33 PF: > { %p309_p13 = scmp.ge.s32.totalorder %s404_s12, 2  ;;  %s241_s3 = sand.u32 1, %s392_s9  }
  0x34   : > { %s242_s4 = scalar_lea.sflag [#allocation3], %s241_s3 }
  0x35   : > { %p306_p0 = pnand %p309_p13, %p466_p6 }
  0x37   : > { %p307_p1 = pneg %p306_p0 }
  0x39   : > { %387 = dma.done.wait (%p307_p1), %s242_s4, 1024  }
  0x3a   : > { %389 = vsyncadd (%p307_p1), %s242_s4, 4294966272  ;;  %p12_p2 = scmp.ge.s32.totalorder %s449_s15, 4   ;;  %s551_s9 = smov %s396_s10 }
  0x3b   : > { %s552_s10 = smov %s400_s11  ;;  %s553_s11 = smov %s460_s18 }
  0x3c   : > { %s554_s12 = smov %s449_s15  ;;  %14 = sbr.rel (!%p12_p2) target bundleno = 3 (0x3), region = 63 }
  0x41   :  { %247 = vsyncpa [#allocation3], 1 }
  0x42   :  { %249 = vsyncpa [#allocation3 + $0x1], 1 }

// kernel: mcn_block_forward.2
= control target key start
LH: loop header
LB: loop body
LE: loop exit
PB: predicated region body
PF: predicated region fallthrough
CT: control target
= control target key end

     0   :  { %s1570_s17 = smov 0   ;;  %s1890_s0 = inlined_call_operand.vmem [shape: f32[128,36], index: 0, kind: input, shape index: {}]   ;;  %s1891_s1 = inlined_call_operand.vmem [shape: f32[36,8], index: 1, kind: input, shape index: {}]   ;;  %s1892_s2 = inlined_call_operand.vmem [shape: f32[1,8], index: 2, kind: input, shape index: {}]   ;;  %s1893_s3 = inlined_call_operand.vmem [shape: f32[128,54], index: 3, kind: input, shape index: {}]   ;;  %s1894_s4 = inlined_call_operand.vmem [shape: f32[54,8], index: 4, kind: input, shape index: {}]   ;;  %s1895_s5 = inlined_call_operand.vmem [shape: f32[1,8], index: 5, kind: input, shape index: {}]   ;;  %s1896_s6 = inlined_call_operand.vmem [shape: f32[128,72], index: 6, kind: input, shape index: {}]   ;;  %s1897_s7 = inlined_call_operand.vmem [shape: f32[72,16], index: 7, kind: input, shape index: {}]   ;;  %s1898_s8 = inlined_call_operand.vmem [shape: f32[1,16], index: 8, kind: input, shape index: {}]   ;;  %s1899_s9 = inlined_call_operand.vmem [shape: f32[1,8], index: 9, kind: input, shape index: {}]   ;;  %s1900_s10 = inlined_call_operand.vmem [shape: f32[128,16], index: 10, kind: output, shape index: {0}]   ;;  %s1901_s11 = inlined_call_operand.vmem [shape: f32[2,2,16], index: 11, kind: output, shape index: {1}]  }
   0x1 LB: > { %s1576_s18 = sadd.s32 4294967295, %s1506_s17   ;;  %p1291_p0 = scmp.ge.s32.totalorder %s1506_s17, 1  ;;  %s1506_s17 = sphi %s1570_s17, %s22_s17  }
   0x2   : > { %p363_p1 = scmp.lt.s32.totalorder %s1506_s17, 3 }
   0x4   : > { %p364_p2 = pnand %p1291_p0, %p363_p1 }
   0x5   : > { %s1292_s25 = sshll.u32 (!%p364_p2), %s1576_s18, 3  ;;  %p441_p4 = scmp.lt.s32.totalorder (!%p364_p2), %s1576_s18, 1 }
   0x6   : > { %367 = sbr.rel (%p364_p2) target bundleno = 508 (0x1fc), region = 60  ;;  %p418_p3 = scmp.lt.s32.totalorder (!%p364_p2), %s1292_s25, 15 }
   0x7   : > { %s1509_s20 = smov (!%p364_p2), 8  }
   0xb   : > { %v457_v0 = vld [vmem:[%s1891_s1 + $0x20] sm:$0xf]  ;;  %vm490_vm0 = vcmask 1043456   ;;  %v456_v1 = vld [vmem:[%s1891_s1 + $0x18] sm:$0xff]  ;;  %vm646_vm1 = vcmask 1045504   ;;  %v455_v3 = vld [vmem:[%s1891_s1 + $0x10] sm:$0xff] }
   0xc   : > { %1378 = vmatprep.subr.msk.mxu0 %vm490_vm0, %v457_v0  ;;  %v613_v2 = vld [vmem:[%s1894_s4 + $0x30] sm:$0x3f]  ;;  %v612_v4 = vld [vmem:[%s1894_s4 + $0x28] sm:$0xff]  ;;  %v611_v5 = vld [vmem:[%s1894_s4 + $0x20] sm:$0xff]  ;;  %s1903_s25 = smov (!%p418_p3, %s1292_s25), 15  ;;  %vm465_vm2 = vcmask 293888  }
   0xd   : > { %1379 = vmatpush3.msk.msra.mxu0 %vm490_vm0, %v457_v0  ;;  %1400 = vmatprep.subr.msk.mxu1 %vm646_vm1, %v613_v2  ;;  %v454_v6 = vld [vmem:[%s1891_s1 + $0x8] sm:$0xff]  ;;  %v610_v7 = vld [vmem:[%s1894_s4 + $0x18] sm:$0xff]  ;;  %v453_v8 = vld [vmem:[%s1891_s1] sm:$0xff]  ;;  %s1608_s21 = sshll.u32 %s1903_s25, 3  ;;  %vm621_vm3 = vcmask 441344   ;;  %vm779_vm4 = vcmask 588800  }
   0xe   : > { %1380 = vmatprep.subr.mxu0 %v456_v1  ;;  %1401 = vmatpush3.msk.msra.mxu1 %vm646_vm1, %v613_v2  ;;  %s1614_s24 = scalar_lea.vmem %s1890_s0, %s1608_s21  ;;  %v771_v11 = vld [vmem:[%s1897_s7 + $0x40] sm:$0xff]  ;;  %v770_v13 = vld [vmem:[%s1897_s7 + $0x38] sm:$0xff]  ;;  %v609_v14 = vld [vmem:[%s1894_s4 + $0x10] sm:$0xff]  ;;  %s1647_s23 = scalar_lea.vmem %s1893_s3, %s1608_s21  ;;  %vm1012_vm5 = vcmask 64512   ;;  %vm1083_vm6 = vcmask 57344   ;;  %vm1053_vm15 = vcmask 130112  }
   0xf   : > { %1381 = vmatpush3.msra.mxu0 %v456_v1  ;;  %1402 = vmatprep.subr.mxu1 %v612_v4  ;;  %v445_v9 = vld [vmem:[%s1614_s24] sm:$0xff]  ;;  %v446_v10 = vld [vmem:[%s1614_s24 + $0x8] sm:$0xff]  ;;  %v447_v12 = vld [vmem:[%s1614_s24 + $0x10] sm:$0xff]  ;;  %s1680_s19 = scalar_lea.vmem %s1896_s6, %s1608_s21  ;;  %s1743_s28 = scalar_lea.vmem %s1900_s10, %s1608_s21  ;;  %vm1140_vm0 = vcmask 122944  }
  0x10   : > { %1382 = vmatprep.subr.mxu0 %v455_v3  ;;  %1403 = vmatpush3.msra.mxu1 %v612_v4  ;;  %v448_v15 = vld [vmem:[%s1614_s24 + $0x18] sm:$0xff]  ;;  %v769_v16 = vld [vmem:[%s1897_s7 + $0x30] sm:$0xff]  ;;  %v449_v17 = vld [vmem:[%s1614_s24 + $0x20] sm:$0xff]  ;;  %s1508_s21 = smov 120   ;;  %s1905_s18 = smov (!%p441_p4, %s1576_s18), 1 }
  0x11   : > { %1383 = vmatpush3.msra.mxu0 %v455_v3  ;;  %1404 = vmatprep.subr.mxu1 %v611_v5  ;;  %v768_v18 = vld [vmem:[%s1897_s7 + $0x28] sm:$0xff]  ;;  %v767_v21 = vld [vmem:[%s1897_s7 + $0x20] sm:$0xff]  ;;  %v766_v24 = vld [vmem:[%s1897_s7 + $0x18] sm:$0xff]  ;;  %s1300_s29 = sshll.u32 %s1905_s18, 1 }
  0x12   : > { %1384 = vmatprep.subr.mxu0 %v454_v6  ;;  %1405 = vmatpush3.msra.mxu1 %v611_v5  ;;  %v608_v19 = vld [vmem:[%s1894_s4 + $0x8] sm:$0xff]  ;;  %v607_v22 = vld [vmem:[%s1894_s4] sm:$0xff]  ;;  %v451_v25 = vld [vmem:[%s1614_s24 + $0x30] sm:$0xff]  ;;  %s1798_s13 = scalar_lea.vmem %s1901_s11, %s1300_s29 }
  0x13   : > { %1385 = vmatpush3.msra.mxu0 %v454_v6  ;;  %1406 = vmatprep.subr.mxu1 %v610_v7  ;;  %v450_v20 = vld [vmem:[%s1614_s24 + $0x28] sm:$0xff]  ;;  %v599_v23 = vld [vmem:[%s1647_s23] sm:$0xff]  ;;  %v452_v27 = vld [vmem:[%s1614_s24 + $0x38] sm:$0xff] }
  0x14   : > { %1386 = vmatprep.subr.mxu0 %v453_v8  ;;  %1388 = vmatprep.mubr.msk.f32.mxu0 %vm465_vm2, %v445_v9  ;;  %v600_v26 = vld [vmem:[%s1647_s23 + $0x8] sm:$0xff]  ;;  %v765_v28 = vld [vmem:[%s1897_s7 + $0x10] sm:$0xff]  ;;  %v602_v31 = vld [vmem:[%s1647_s23 + $0x18] sm:$0xff] }
  0x15   : > { %1387 = vmatpush3.msra.mxu0 %v453_v8  ;;  %1407 = vmatpush3.msra.mxu1 %v610_v7  ;;  %v764_v29 = vld [vmem:[%s1897_s7 + $0x8] sm:$0xff]  ;;  %v601_v30 = vld [vmem:[%s1647_s23 + $0x10] sm:$0xff]  ;;  %v763_v32 = vld [vmem:[%s1897_s7] sm:$0xff] }
  0x16   : > { %1389 = vmatmul.mubr.msk.f32.vlgmr.msra.gmra.mxu0 %vm465_vm2, %v446_v10  ;;  %1426 = vmatprep.subr.mxu0 %v771_v11  ;;  %v755_v33 = vld [vmem:[%s1680_s19] sm:$0xff]  ;;  %v756_v34 = vld [vmem:[%s1680_s19 + $0x8] sm:$0xff]  ;;  %v757_v37 = vld [vmem:[%s1680_s19 + $0x10] sm:$0xff] }
  0x17   : > { %1427 = vmatpush3.msra.mxu0 %v771_v11  ;;  %1391 = vmatprep.mubr.msk.f32.mxu0 %vm465_vm2, %v447_v12  ;;  %v603_v35 = vld [vmem:[%s1647_s23 + $0x20] sm:$0xff]  ;;  %v604_v36 = vld [vmem:[%s1647_s23 + $0x28] sm:$0xff]  ;;  %v758_v38 = vld [vmem:[%s1680_s19 + $0x18] sm:$0xff] }
  0x18   : > { %1428 = vmatprep.subr.mxu0 %v770_v13  ;;  %1408 = vmatprep.subr.mxu1 %v609_v14  ;;  %v605_v39 = vld [vmem:[%s1647_s23 + $0x30] sm:$0xff]  ;;  %v606_v40 = vld [vmem:[%s1647_s23 + $0x38] sm:$0xff]  ;;  %v759_v41 = vld [vmem:[%s1680_s19 + $0x20] sm:$0xff] }
  0x19   : > { %1429 = vmatpush3.msra.mxu0 %v770_v13  ;;  %1409 = vmatpush3.msra.mxu1 %v609_v14  ;;  %v760_v42 = vld [vmem:[%s1680_s19 + $0x28] sm:$0xff]  ;;  %v761_v43 = vld [vmem:[%s1680_s19 + $0x30] sm:$0xff]  ;;  %v762_v44 = vld [vmem:[%s1680_s19 + $0x38] sm:$0xff] }
  0x1a   : > { %1392 = vmatmul.mubr.msk.f32.gmra.mxu0 %vm465_vm2, %v448_v15  ;;  %1430 = vmatprep.subr.mxu0 %v769_v16  ;;  %v1321_v56 = vld [vmem:[%s1898_s8] ss:$0 sm:$0xff] }
  0x1b   : > { %1431 = vmatpush3.msra.mxu0 %v769_v16  ;;  %1394 = vmatprep.mubr.msk.f32.mxu0 %vm465_vm2, %v449_v17 }
  0x1c   : > { %1432 = vmatprep.subr.mxu0 %v768_v18  ;;  %1410 = vmatprep.subr.mxu1 %v608_v19 }
  0x1d   : > { %1433 = vmatpush3.msra.mxu0 %v768_v18  ;;  %1411 = vmatpush3.msra.mxu1 %v608_v19 }
  0x1e   : > { %1395 = vmatmul.mubr.msk.f32.gmra.mxu0 %vm465_vm2, %v450_v20  ;;  %1434 = vmatprep.subr.mxu0 %v767_v21 }
  0x1f   : > { %1412 = vmatprep.subr.mxu1 %v607_v22  ;;  %1435 = vmatpush3.msra.mxu0 %v767_v21 }
  0x20   : > { %1413 = vmatpush3.msra.mxu1 %v607_v22  ;;  %1414 = vmatprep.mubr.msk.f32.mxu1 %vm621_vm3, %v599_v23 }
  0x21   : > { %1436 = vmatprep.subr.mxu0 %v766_v24  ;;  %1397 = vmatprep.mubr.msk.f32.mxu0 %vm465_vm2, %v451_v25 }
  0x22   : > { %1415 = vmatmul.mubr.msk.f32.vlgmr.msra.gmra.mxu1 %vm621_vm3, %v600_v26  ;;  %1437 = vmatpush3.msra.mxu0 %v766_v24 }
  0x23   : > { %1398 = vmatmul.mubr.msk.f32.gmra.mxu0 %vm465_vm2, %v452_v27  ;;  %1456 = vmatprep.subr.mxu1 %v771_v11 }
  0x24   : > { %1438 = vmatprep.subr.mxu0 %v765_v28  ;;  %1465 = vmatpush3.msra.mxu1 %v771_v11 }
  0x25   : > { %1439 = vmatpush3.msra.mxu0 %v765_v28  ;;  %1457 = vmatprep.subr.mxu1 %v770_v13 }
  0x26   : > { %1440 = vmatprep.subr.mxu0 %v764_v29  ;;  %1417 = vmatprep.mubr.msk.f32.mxu1 %vm621_vm3, %v601_v30 }
  0x27   : > { %1466 = vmatpush3.msra.mxu1 %v770_v13  ;;  %1441 = vmatpush3.msra.mxu0 %v764_v29 }
  0x28   : > { %1418 = vmatmul.mubr.msk.f32.gmra.mxu1 %vm621_vm3, %v602_v31  ;;  %1458 = vmatprep.subr.mxu1 %v769_v16 }
  0x29   : > { %1442 = vmatprep.subr.mxu0 %v763_v32  ;;  %1467 = vmatpush3.msra.mxu1 %v769_v16 }
  0x2a   : > { %1443 = vmatpush3.msra.mxu0 %v763_v32  ;;  %1444 = vmatprep.mubr.msk.f32.mxu0 %vm779_vm4, %v755_v33 }
  0x2b   : > { %1459 = vmatprep.subr.mxu1 %v768_v18  ;;  %1445 = vmatmul.mubr.msk.f32.vlgmr.msra.gmra.mxu0 %vm779_vm4, %v756_v34 }
  0x2c   : > { %1420 = vmatprep.mubr.msk.f32.mxu1 %vm621_vm3, %v603_v35  ;;  %1468 = vmatpush3.msra.mxu1 %v768_v18 }
  0x2d   : > { %1421 = vmatmul.mubr.msk.f32.gmra.mxu1 %vm621_vm3, %v604_v36  ;;  %1460 = vmatprep.subr.mxu1 %v767_v21 }
  0x2e   : > { %1469 = vmatpush3.msra.mxu1 %v767_v21  ;;  %1447 = vmatprep.mubr.msk.f32.mxu0 %vm779_vm4, %v757_v37 }
  0x2f   : > { %1461 = vmatprep.subr.mxu1 %v766_v24  ;;  %1448 = vmatmul.mubr.msk.f32.gmra.mxu0 %vm779_vm4, %v758_v38 }
  0x30   : > { %1423 = vmatprep.mubr.msk.f32.mxu1 %vm621_vm3, %v605_v39  ;;  %1470 = vmatpush3.msra.mxu1 %v766_v24 }
  0x31   : > { %1424 = vmatmul.mubr.msk.f32.gmra.mxu1 %vm621_vm3, %v606_v40  ;;  %1462 = vmatprep.subr.mxu1 %v765_v28 }
  0x32   : > { %1471 = vmatpush3.msra.mxu1 %v765_v28  ;;  %1450 = vmatprep.mubr.msk.f32.mxu0 %vm779_vm4, %v759_v41 }
  0x33   : > { %1463 = vmatprep.subr.mxu1 %v764_v29  ;;  %1451 = vmatmul.mubr.msk.f32.gmra.mxu0 %vm779_vm4, %v760_v42 }
  0x34   : > { %1472 = vmatpush3.msra.mxu1 %v764_v29  ;;  %1453 = vmatprep.mubr.msk.f32.mxu1 %vm779_vm4, %v761_v43 }
  0x35   : > { %1464 = vmatprep.subr.mxu1 %v763_v32 }
  0x36   : > { %1473 = vmatpush3.msra.mxu1 %v763_v32 }
  0x37   : > { %1454 = vmatmul.mubr.msk.f32.vlgmr.msra.gmra.mxu1 %vm779_vm4, %v762_v44 }
  0xd6   : > { %v1712_v45 = vpop.f32.mrf.mxu0 }
  0xd8   : > { %v1714_v46 = vpop.f32.mrf.mxu0 }
  0xda   : > { %v1716_v47 = vpop.f32.mrf.mxu0 }
  0xdc   : > { %v1718_v48 = vpop.f32.mrf.mxu0 }
  0xde   : > { %v1720_v49 = vpop.f32.mrf.mxu0 }
  0xe0   : > { %v1722_v50 = vpop.f32.mrf.mxu0 }
  0xe2   : > { %v1724_v51 = vpop.f32.mrf.mxu1 }
  0xe3   : > { %v1728_v53 = vpop.f32.mrf.mxu0 }
  0xe4   : > { %v1726_v52 = vpop.f32.mrf.mxu1 }
  0xe5   : > { %v1732_v55 = vpop.f32.mrf.mxu0 }
  0xe8   : > { %v1730_v54 = vpop.f32.mrf.mxu1 }
  0xea   : > { %v1737_v57 = vpop.f32.mrf.mxu1 }
  0xeb   : > { %v1446_v58 = vpop.f32.mrf.mxu0 }
  0xec   : > { %v876_v59 = vadd.f32 %v1446_v58, %v1321_v56 }
  0xed   : > { %v1745_v60 = vpop.f32.mrf.mxu1  ;;  %v870_v61 = vpop.f32.mrf.mxu0 }
  0xee   : > { %1014 = vst.msk [vmem:[%s1743_s28 + $0x8] sm:$0xff] %vm1012_vm5, %v876_v59  ;;  %v871_v62 = vadd.f32 %v1321_v56, %v870_v61  ;;  %v1086_v1 = vmul.f32 %v876_v59, %v876_v59  ;;  %v1063_v7 = vsel %vm1012_vm5, %v876_v59, 0.0 }
  0xef   : > { %v1749_v63 = vpop.f32.mrf.mxu1  ;;  %v1449_v0 = vpop.f32.mrf.mxu0 }
  0xf0   : > { %v1062_v2 = vsel %vm1012_vm5, %v871_v62, 0.0  ;;  %v1085_v3 = vmul.f32 %v871_v62, %v871_v62  ;;  %1013 = vst.msk [vmem:[%s1743_s28] sm:$0xff] %vm1012_vm5, %v871_v62  ;;  %972 = vrot.lane.b32.xlu0 %v871_v62, %s1508_s21  ;;  %v886_v4 = vadd.f32 %v1449_v0, %v1321_v56  ;;  %v1094_v13 = vsel %vm1012_vm5, %v1086_v1, 0.0 }
  0xf1   : > { %v1755_v5 = vpop.f32.mrf.mxu1  ;;  %v880_v6 = vpop.f32.mrf.mxu0  ;;  %v1064_v10 = vadd.f32 %v1063_v7, %v1062_v2 }
  0xf2   : > { %v1093_v8 = vsel %vm1012_vm5, %v1085_v3, 0.0  ;;  %v881_v9 = vadd.f32 %v1321_v56, %v880_v6  ;;  %v1088_v11 = vmul.f32 %v886_v4, %v886_v4  ;;  %1016 = vst.msk [vmem:[%s1743_s28 + $0x18] sm:$0xff] %vm1012_vm5, %v886_v4  ;;  %v1067_v21 = vsel %vm1012_vm5, %v886_v4, 0.0 }
  0xf3   : > { %v1452_v12 = vpop.f32.mrf.mxu0  ;;  %v1095_v16 = vadd.f32 %v1094_v13, %v1093_v8  ;;  %v1767_v18 = vpop.f32.mrf.mxu1 }
  0xf4   : > { %v1065_v14 = vsel %vm1012_vm5, %v881_v9, 0.0  ;;  %v1087_v15 = vmul.f32 %v881_v9, %v881_v9  ;;  %1015 = vst.msk [vmem:[%s1743_s28 + $0x10] sm:$0xff] %vm1012_vm5, %v881_v9  ;;  %976 = vrot.lane.b32.xlu1 %v881_v9, %s1508_s21  ;;  %974 = vrot.lane.b32.xlu0 %v876_v59, %s1508_s21  ;;  %v896_v19 = vadd.f32 %v1452_v12, %v1321_v56  ;;  %v1098_v24 = vsel %vm1012_vm5, %v1088_v11, 0.0 }
  0xf5   : > { %v1066_v17 = vadd.f32 %v1065_v14, %v1064_v10  ;;  %v890_v20 = vpop.f32.mrf.mxu0 }
  0xf6   : > { %v1096_v22 = vsel %vm1012_vm5, %v1087_v15, 0.0  ;;  %v891_v23 = vadd.f32 %v1321_v56, %v890_v20  ;;  %1018 = vst.msk [vmem:[%s1743_s28 + $0x28] sm:$0xff] %vm1012_vm5, %v896_v19  ;;  %v1090_v28 = vmul.f32 %v896_v19, %v896_v19  ;;  %v1071_v35 = vsel %vm1012_vm5, %v896_v19, 0.0  ;;  %v1301_v15 = vld [vmem:[%s1892_s2] ss:$0 sm:$0xff] }
  0xf7   : > { %v1097_v25 = vadd.f32 %v1096_v22, %v1095_v16  ;;  %v1068_v26 = vadd.f32 %v1067_v21, %v1066_v17  ;;  %v1455_v27 = vpop.f32.mrf.mxu1  ;;  %v561_v16 = vadd.f32 %v1301_v15, %v1714_v46  ;;  %v566_v17 = vadd.f32 %v1712_v45, %v1301_v15  ;;  %v1311_v45 = vld [vmem:[%s1895_s5] ss:$0 sm:$0xff] }
  0xf8   : > { %v1069_v29 = vsel %vm1012_vm5, %v891_v23, 0.0  ;;  %v1089_v30 = vmul.f32 %v891_v23, %v891_v23  ;;  %1017 = vst.msk [vmem:[%s1743_s28 + $0x20] sm:$0xff] %vm1012_vm5, %v891_v23  ;;  %v906_v31 = vadd.f32 %v1455_v27, %v1321_v56  ;;  %978 = vrot.lane.b32.xlu1 %v886_v4, %s1508_s21  ;;  %980 = vrot.lane.b32.xlu0 %v891_v23, %s1508_s21  ;;  %v1102_v40 = vsel %vm1012_vm5, %v1090_v28, 0.0 }
  0xf9   : > { %v1070_v32 = vadd.f32 %v1069_v29, %v1068_v26  ;;  %v1099_v33 = vadd.f32 %v1098_v24, %v1097_v25  ;;  %v900_v34 = vpop.f32.mrf.mxu1  ;;  %v909_v20 = vmul.f32 1.442695, %v561_v16  ;;  %v571_v21 = vadd.f32 %v1301_v15, %v1718_v48 }
  0xfa   : > { %v1100_v36 = vsel %vm1012_vm5, %v1089_v30, 0.0  ;;  %1020 = vst.msk [vmem:[%s1743_s28 + $0x38] sm:$0xff] %vm1012_vm5, %v906_v31  ;;  %v901_v37 = vadd.f32 %v1321_v56, %v900_v34  ;;  %v1092_v41 = vmul.f32 %v906_v31, %v906_v31  ;;  %v1075_v56 = vsel %vm1012_vm5, %v906_v31, 0.0 }
  0xfb   : > { %v1101_v38 = vadd.f32 %v1100_v36, %v1099_v33  ;;  %v1072_v39 = vadd.f32 %v1071_v35, %v1070_v32  ;;  %v586_v22 = vadd.f32 %v1720_v49, %v1301_v15  ;;  %v911_v23 = vmul.f32 1.442695, %v566_v17 }
  0xfc   : > { %v1073_v42 = vsel %vm1012_vm5, %v901_v37, 0.0  ;;  %v1091_v43 = vmul.f32 %v901_v37, %v901_v37  ;;  %1019 = vst.msk [vmem:[%s1743_s28 + $0x30] sm:$0xff] %vm1012_vm5, %v901_v37  ;;  %982 = vrot.lane.b32.xlu1 %v896_v19, %s1508_s21  ;;  %984 = vrot.lane.b32.xlu0 %v901_v37, %s1508_s21  ;;  %v1106_v0 = vsel %vm1012_vm5, %v1092_v41, 0.0  ;;  %v576_v19 = vadd.f32 %v1716_v47, %v1301_v15 }
  0xfd   : > { %v1074_v44 = vadd.f32 %v1073_v42, %v1072_v39  ;;  %v1103_v58 = vadd.f32 %v1102_v40, %v1101_v38  ;;  %v581_v25 = vadd.f32 %v1301_v15, %v1722_v50  ;;  %1484 = vpow2.f32 %v909_v20 }
  0xfe   : > { %v1104_v59 = vsel %vm1012_vm5, %v1091_v43, 0.0  ;;  %v915_v24 = vmul.f32 1.442695, %v576_v19  ;;  %v913_v26 = vmul.f32 1.442695, %v571_v21  ;;  %1486 = vpow2.f32 %v911_v23 }
  0xff   : > { %v1076_v61 = vadd.f32 %v1075_v56, %v1074_v44  ;;  %v1105_v62 = vadd.f32 %v1104_v59, %v1103_v58  ;;  %v919_v27 = vmul.f32 1.442695, %v586_v22  ;;  %v917_v28 = vmul.f32 1.442695, %v581_v25 }
 0x100   : > { %986 = vrot.lane.b32.xlu1 %v906_v31, %s1508_s21  ;;  %1488 = vpow2.f32 %v915_v24  ;;  %v591_v46 = vadd.f32 %v1301_v15, %v1732_v55  ;;  %v596_v47 = vadd.f32 %v1728_v53, %v1301_v15  ;;  %v717_v48 = vadd.f32 %v1311_v45, %v1726_v52  ;;  %v1823_v55 = vld [vmem:[%s1899_s9] ss:$0 sm:$0xff] }
 0x101   : > { %v1077_v1 = vrot.slane %v1076_v61, 4  ;;  %v1107_v2 = vadd.f32 %v1106_v0, %v1105_v62  ;;  %1490 = vpow2.f32 %v913_v26  ;;  %v722_v50 = vadd.f32 %v1724_v51, %v1311_v45 }
 0x102   : > { %1492 = vpow2.f32 %v919_v27  ;;  %v921_v49 = vmul.f32 1.442695, %v591_v46  ;;  %v923_v29 = vmul.f32 1.442695, %v596_v47  ;;  %v948_v30 = vmul.f32 0.15, %v717_v48 }
 0x103   : > { %v1078_v3 = vadd.f32 %v1077_v1, %v1076_v61  ;;  %v1108_v4 = vrot.slane %v1107_v2, 4  ;;  %1494 = vpow2.f32 %v917_v28  ;;  %v727_v31 = vadd.f32 %v1311_v45, %v1737_v57 }
 0x104   : > { %1496 = vpow2.f32 %v921_v49  ;;  %vm940_vm7 = vcmp.ge.f32.partialorder %v717_v48, 0.0  ;;  %v949_v33 = vmul.f32 0.15, %v722_v50  ;;  %v732_v34 = vadd.f32 %v1730_v54, %v1311_v45 }
 0x105   : > { %v1079_v6 = vrot.slane %v1078_v3, 2  ;;  %v1109_v7 = vadd.f32 %v1108_v4, %v1107_v2  ;;  %vm941_vm8 = vcmp.ge.f32.partialorder %v722_v50, 0.0  ;;  %1498 = vpow2.f32 %v923_v29 }
 0x106   : > { %v950_v53 = vmul.f32 0.15, %v727_v31  ;;  %v737_v51 = vadd.f32 %v1311_v45, %v1749_v63  ;;  %v956_v35 = vsel %vm940_vm7, %v717_v48, %v948_v30  ;;  %vm942_vm9 = vcmp.ge.f32.partialorder %v727_v31, 0.0 }
 0x107   : > { %v1080_v8 = vadd.f32 %v1079_v6, %v1078_v3  ;;  %v1110_v9 = vrot.slane %v1109_v7, 2  ;;  %v951_v54 = vmul.f32 0.15, %v732_v34  ;;  %v742_v40 = vadd.f32 %v1745_v60, %v1311_v45 }
 0x108   : > { %v957_v41 = vsel %vm941_vm8, %v722_v50, %v949_v33  ;;  %v747_v43 = vadd.f32 %v1311_v45, %v1767_v18  ;;  %vm943_vm10 = vcmp.ge.f32.partialorder %v732_v34, 0.0  ;;  %v952_v63 = vmul.f32 0.15, %v737_v51 }
 0x109   : > { %v1081_v10 = vrot.slane %v1080_v8, 1  ;;  %v1111_v11 = vadd.f32 %v1110_v9, %v1109_v7  ;;  %v1831_v56 = vadd.f32 %v1755_v5, %v1311_v45  ;;  %v958_v59 = vsel %vm942_vm9, %v727_v31, %v950_v53 }
 0x10a   : > { %v1485_v32 = vpop.eup %1484  ;;  %vm944_vm11 = vcmp.ge.f32.partialorder %v737_v51, 0.0  ;;  %v953_v18 = vmul.f32 0.15, %v742_v40  ;;  %v959_v4 = vsel %vm943_vm10, %v732_v34, %v951_v54  ;;  %vm945_vm12 = vcmp.ge.f32.partialorder %v742_v40, 0.0 }
 0x10b   : > { %v1082_v12 = vadd.f32 %v1081_v10, %v1080_v8  ;;  %v1112_v13 = vrot.slane %v1111_v11, 1  ;;  %v1487_v52 = vpop.eup %1486  ;;  %v932_v37 = vmul.f32 %v1485_v32, %v1823_v55  ;;  %v954_v5 = vmul.f32 0.15, %v747_v43 }
 0x10c   : > { %v933_v58 = vmul.f32 %v1487_v52, %v1823_v55  ;;  %v955_v10 = vmul.f32 0.15, %v1831_v56  ;;  %vm946_vm13 = vcmp.ge.f32.partialorder %v747_v43, 0.0  ;;  %v961_v24 = vsel %vm945_vm12, %v742_v40, %v953_v18 }
 0x10d   : > { %1084 = vst.msk [vmem:[%s1798_s13] sm:$0x1] %vm1083_vm6, %v1082_v12  ;;  %v1113_v14 = vadd.f32 %v1112_v13, %v1111_v11  ;;  %v1489_v57 = vpop.eup %1488  ;;  %v960_v12 = vsel %vm944_vm11, %v737_v51, %v952_v63  ;;  %v962_v28 = vsel %vm946_vm13, %v747_v43, %v954_v5  ;;  %vm947_vm14 = vcmp.ge.f32.partialorder %v1831_v56, 0.0 }
 0x10e   : > { %v1491_v39 = vpop.eup %1490  ;;  %v935_v0 = vmul.f32 %v1489_v57, %v1823_v55  ;;  %v963_v43 = vsel %vm947_vm14, %v1831_v56, %v955_v10 }
 0x10f   : > { %1114 = vst.msk [vmem:[%s1798_s13 + $0x1] sm:$0x1] %vm1083_vm6, %v1113_v14  ;;  %v1493_v42 = vpop.eup %1492  ;;  %v934_v60 = vmul.f32 %v1491_v39, %v1823_v55 }
 0x110   : > { %v1495_v1 = vpop.eup %1494  ;;  %v937_v6 = vmul.f32 %v1493_v42, %v1823_v55 }
 0x111   : > { %v936_v14 = vmul.f32 %v1495_v1, %v1823_v55  ;;  %v1497_v20 = vpop.eup %1496 }
 0x112   : > { %v1499_v29 = vpop.eup %1498  ;;  %v938_v32 = vmul.f32 %v1497_v20, %v1823_v55 }
 0x113   : > { %v939_v39 = vmul.f32 %v1499_v29, %v1823_v55 }
 0x162   : > { %v973_v36 = vpop.permute.xlu0 %972 }
 0x163   : > { %v996_v38 = vmax.f32 %v956_v35, %v973_v36 }
 0x165   : > { %v1004_v44 = vadd.f32 %v996_v38, %v932_v37 }
 0x166   : > { %v977_v61 = vpop.permute.xlu1 %976  ;;  %v975_v62 = vpop.permute.xlu0 %974 }
 0x167   : > { %v998_v2 = vmax.f32 %v958_v59, %v977_v61  ;;  %v997_v3 = vmax.f32 %v957_v41, %v975_v62  ;;  %1029 = vrot.lane.b32.xlu0 %v1004_v44, %s1509_s20  ;;  %v1142_v7 = vmul.f32 %v1004_v44, %v1004_v44  ;;  %v1115_v15 = vsel %vm1012_vm5, %v1004_v44, 0.0 }
 0x169   : > { %v1006_v8 = vadd.f32 %v998_v2, %v934_v60  ;;  %v1005_v9 = vadd.f32 %v997_v3, %v933_v58  ;;  %v1150_v25 = vsel %vm1012_vm5, %v1142_v7, 0.0 }
 0x16a   : > { %v979_v11 = vpop.permute.xlu1 %978  ;;  %v981_v13 = vpop.permute.xlu0 %980 }
 0x16b   : > { %v1144_v16 = vmul.f32 %v1006_v8, %v1006_v8  ;;  %v1116_v17 = vsel %vm1012_vm5, %v1005_v9, 0.0  ;;  %v1143_v19 = vmul.f32 %v1005_v9, %v1005_v9  ;;  %1031 = vrot.lane.b32.xlu1 %v1005_v9, %s1509_s20  ;;  %1033 = vrot.lane.b32.xlu0 %v1006_v8, %s1509_s20  ;;  %v999_v22 = vmax.f32 %v959_v4, %v979_v11 }
 0x16c   : > { %v1117_v21 = vadd.f32 %v1116_v17, %v1115_v15  ;;  %v1000_v23 = vmax.f32 %v960_v12, %v981_v13  ;;  %v1118_v26 = vsel %vm1012_vm5, %v1006_v8, 0.0 }
 0x16d   : > { %v1151_v27 = vsel %vm1012_vm5, %v1143_v19, 0.0  ;;  %v1007_v46 = vadd.f32 %v999_v22, %v935_v0  ;;  %v1153_v30 = vsel %vm1012_vm5, %v1144_v16, 0.0 }
 0x16e   : > { %v1152_v45 = vadd.f32 %v1151_v27, %v1150_v25  ;;  %v1119_v47 = vadd.f32 %v1118_v26, %v1117_v21  ;;  %v1008_v48 = vadd.f32 %v1000_v23, %v936_v14  ;;  %v983_v49 = vpop.permute.xlu1 %982  ;;  %v985_v50 = vpop.permute.xlu0 %984 }
 0x16f   : > { %v1001_v31 = vmax.f32 %v961_v24, %v983_v49  ;;  %v1002_v33 = vmax.f32 %v962_v28, %v985_v50  ;;  %v1120_v34 = vsel %vm1012_vm5, %v1007_v46, 0.0  ;;  %v1145_v52 = vmul.f32 %v1007_v46, %v1007_v46  ;;  %1035 = vrot.lane.b32.xlu1 %v1007_v46, %s1509_s20 }
 0x170   : > { %v1154_v53 = vadd.f32 %v1153_v30, %v1152_v45  ;;  %v1121_v51 = vadd.f32 %v1120_v34, %v1119_v47  ;;  %v1146_v35 = vmul.f32 %v1008_v48, %v1008_v48  ;;  %v1122_v38 = vsel %vm1012_vm5, %v1008_v48, 0.0 }
 0x171   : > { %v1009_v36 = vadd.f32 %v1001_v31, %v937_v6  ;;  %v1010_v57 = vadd.f32 %v1002_v33, %v938_v32  ;;  %v1155_v37 = vsel %vm1012_vm5, %v1145_v52, 0.0 }
 0x172   : > { %v987_v54 = vpop.permute.xlu1 %986  ;;  %v1156_v40 = vadd.f32 %v1155_v37, %v1154_v53  ;;  %v1123_v41 = vadd.f32 %v1122_v38, %v1121_v51  ;;  %v1157_v44 = vsel %vm1012_vm5, %v1146_v35, 0.0 }
 0x173   : > { %v1124_v42 = vsel %vm1012_vm5, %v1009_v36, 0.0  ;;  %1041 = vrot.lane.b32.xlu0 %v1010_v57, %s1509_s20  ;;  %v1147_v58 = vmul.f32 %v1009_v36, %v1009_v36  ;;  %v1148_v63 = vmul.f32 %v1010_v57, %v1010_v57  ;;  %v1003_v59 = vmax.f32 %v963_v43, %v987_v54 }
 0x174   : > { %v1158_v61 = vadd.f32 %v1157_v44, %v1156_v40  ;;  %v1125_v62 = vadd.f32 %v1124_v42, %v1123_v41  ;;  %v1126_v55 = vsel %vm1012_vm5, %v1010_v57, 0.0 }
 0x175   : > { %v1159_v0 = vsel %vm1012_vm5, %v1147_v58, 0.0  ;;  %v1011_v1 = vadd.f32 %v1003_v59, %v939_v39  ;;  %v1161_v56 = vsel %vm1012_vm5, %v1148_v63, 0.0 }
 0x176   : > { %v1160_v60 = vadd.f32 %v1159_v0, %v1158_v61  ;;  %v1127_v2 = vadd.f32 %v1126_v55, %v1125_v62 }
 0x177   : > { %1037 = vrot.lane.b32.xlu0 %v1008_v48, %s1509_s20  ;;  %v1128_v3 = vsel %vm1012_vm5, %v1011_v1, 0.0  ;;  %v1149_v18 = vmul.f32 %v1011_v1, %v1011_v1  ;;  %1043 = vrot.lane.b32.xlu1 %v1011_v1, %s1509_s20 }
 0x178   : > { %v1162_v4 = vadd.f32 %v1161_v56, %v1160_v60  ;;  %v1129_v6 = vadd.f32 %v1128_v3, %v1127_v2 }
 0x179   : > { %v1163_v5 = vsel %vm1012_vm5, %v1149_v18, 0.0 }
 0x17a   : > { %v1130_v7 = vrot.slane %v1129_v6, 4  ;;  %v1164_v8 = vadd.f32 %v1163_v5, %v1162_v4 }
 0x17b   : > { %1039 = vrot.lane.b32.xlu1 %v1009_v36, %s1509_s20 }
 0x17c   : > { %v1131_v9 = vadd.f32 %v1130_v7, %v1129_v6  ;;  %v1165_v10 = vrot.slane %v1164_v8, 4 }
 0x17e   : > { %v1132_v11 = vrot.slane %v1131_v9, 2  ;;  %v1166_v12 = vadd.f32 %v1165_v10, %v1164_v8 }
 0x180   : > { %v1133_v13 = vadd.f32 %v1132_v11, %v1131_v9  ;;  %v1167_v14 = vrot.slane %v1166_v12, 2 }
 0x182   : > { %v1134_v15 = vrot.slane %v1133_v13, 1  ;;  %v1168_v16 = vadd.f32 %v1167_v14, %v1166_v12 }
 0x184   : > { %v1135_v17 = vadd.f32 %v1134_v15, %v1133_v13  ;;  %v1169_v19 = vrot.slane %v1168_v16, 1 }
 0x186   : > { %1137 = vrot.lane.b32.xlu0 %v1135_v17, %s1509_s20  ;;  %v1170_v20 = vadd.f32 %v1169_v19, %v1168_v16 }
 0x188   : > { %1172 = vrot.lane.b32.xlu1 %v1170_v20, %s1509_s20 }
 0x1d9   : > { %v1030_v21 = vpop.permute.xlu0 %1029 }
 0x1da   : > { %1054 = vst.msk [vmem:[%s1743_s28] sm:$0xff] %vm1053_vm15, %v1030_v21 }
 0x1dd   : > { %v1032_v22 = vpop.permute.xlu1 %1031  ;;  %v1034_v23 = vpop.permute.xlu0 %1033 }
 0x1de   : > { %1055 = vst.msk [vmem:[%s1743_s28 + $0x8] sm:$0xff] %vm1053_vm15, %v1032_v22  ;;  %1056 = vst.msk [vmem:[%s1743_s28 + $0x10] sm:$0xff] %vm1053_vm15, %v1034_v23 }
 0x1e1   : > { %v1036_v24 = vpop.permute.xlu1 %1035 }
 0x1e2   : > { %1057 = vst.msk [vmem:[%s1743_s28 + $0x18] sm:$0xff] %vm1053_vm15, %v1036_v24 }
 0x1e5   : > { %v1042_v25 = vpop.permute.xlu0 %1041 }
 0x1e6   : > { %1060 = vst.msk [vmem:[%s1743_s28 + $0x30] sm:$0xff] %vm1053_vm15, %v1042_v25 }
 0x1e9   : > { %v1038_v26 = vpop.permute.xlu0 %1037  ;;  %v1044_v27 = vpop.permute.xlu1 %1043 }
 0x1ea   : > { %1058 = vst.msk [vmem:[%s1743_s28 + $0x20] sm:$0xff] %vm1053_vm15, %v1038_v26  ;;  %1061 = vst.msk [vmem:[%s1743_s28 + $0x38] sm:$0xff] %vm1053_vm15, %v1044_v27 }
 0x1ed   : > { %v1040_v28 = vpop.permute.xlu1 %1039 }
 0x1ee   : > { %1059 = vst.msk [vmem:[%s1743_s28 + $0x28] sm:$0xff] %vm1053_vm15, %v1040_v28 }
 0x1f8   : > { %v1138_v45 = vpop.permute.xlu0 %1137 }
 0x1f9   : > { %1141 = vst.msk [vmem:[%s1798_s13] sm:$0x1] %vm1140_vm0, %v1138_v45 }
 0x1fa   : > { %v1173_v46 = vpop.permute.xlu1 %1172 }
 0x1fb   : > { %1175 = vst.msk [vmem:[%s1798_s13 + $0x1] sm:$0x1] %vm1140_vm0, %v1173_v46 }
 0x1fc PF: > { %s22_s17 = sadd.s32 1, %s1506_s17  }
 0x1fd   : > { %p19_p5 = scmp.ge.s32.totalorder %s22_s17, 4  }
 0x1ff   :  { %21 = sbr.rel (!%p19_p5) target bundleno = 1 (0x1), region = 108 }

</bundles_post_ra>
